<compile_context>
chip_gen: v7x
topology: tpu7x:2x2x1
jax: 0.10.0
libtpu: 0.0.40
codegen_flags: <defaults>
</compile_context>

<pallas_src>
import functools

import jax
import jax.numpy as jnp
from jax.experimental import pallas as pl
from jax.experimental.pallas import tpu as pltpu


def _se_block_kernel(x_ref, w1_ref, b1_ref, w2_ref, b2_ref, out_ref, *, inv_len):
    # x_ref/out_ref: (TB, C, Lp)   w1_ref: (H, C)   b1_ref: (1, H)
    # w2_ref: (C, H)               b2_ref: (1, C)
    #
    # Squeeze: f32-accumulated sum over the (possibly zero-padded) length axis,
    # scaled by 1/L_real.  No f32 copy of the whole x tile is materialized.
    pooled = jnp.sum(x_ref[...], axis=-1, dtype=jnp.float32) * inv_len        # (TB, C)

    # Excitation MLP: fc1 -> relu -> fc2 -> sigmoid, batched over the TB tile.
    h = jnp.einsum("bc,hc->bh", pooled, w1_ref[...],
                   preferred_element_type=jnp.float32) + b1_ref[...]          # (TB, H)
    h = jnp.maximum(h, 0.0)
    s = jnp.einsum("bh,ch->bc", h, w2_ref[...],
                   preferred_element_type=jnp.float32) + b2_ref[...]          # (TB, C)
    s = jax.nn.sigmoid(s)                                                     # (TB, C) f32

    # Scale: x stays in its native dtype; only the tiny gate is cast down.
    out_ref[...] = x_ref[...] * s.astype(out_ref.dtype)[:, :, None]


def _tensorcores_per_chip():
    """Dual-TensorCore ('megacore') parts get 2; v5e/v6e get 1."""
    try:
        kind = jax.devices()[0].device_kind.lower()
    except Exception:
        return 1
    return 2 if any(t in kind for t in ("v4", "v5p", "v7", "tpu7")) else 1


def _pick_batch_tile(B, per_batch_bytes, n_cores, target_bytes=6 * 1024 * 1024):
    """Largest TB whose x tile is <= target_bytes.  No divisor requirement (the
    wrapper pads B).  On dual-TC parts keep >= n_cores steps and prefer an even
    step count; on single-TC parts grid==1 is allowed when the batch fits."""
    tb = max(1, min(B, target_bytes // max(per_batch_bytes, 1)))
    if n_cores >= 2 and B > 1:
        tb = min(tb, -(-B // n_cores))        # at least n_cores grid steps
        steps = -(-B // tb)
        if steps % 2 == 1 and steps > 1:
            tb = max(1, -(-B // (steps + 1)))  # nudge toward an even step count
    return tb


def se_block(x, w1, b1, w2, b2, *, donate_x=False):
    """x: (B, C, L). w1: (H, C), b1: (H,), w2: (C, H), b2: (C,)  (nn.Linear layout)."""
    B, C, L = x.shape
    H = w1.shape[0]
    itemsize = jnp.dtype(x.dtype).itemsize

    # Lane-dense store guard: pad L to a multiple of 128 so the writeback is an
    # unmasked vst.  Zero padding never skews the pool (kernel divides by real L)
    # and padded lanes are sliced off below.
    Lp = ((L + 127) // 128) * 128

    n_cores = _tensorcores_per_chip()
    TB = _pick_batch_tile(B, C * Lp * itemsize, n_cores)
    grid_b = -(-B // TB)          # cdiv
    Bp = grid_b * TB              # pad B so every block is full (no partial blocks)

    # TODO(synk): if C*Lp per batch element ever exceeds the VMEM budget (TB=1
    # tile too big), tile L inside the step with masked accumulation instead.

    xp = x
    if (Bp != B) or (Lp != L):
        xp = jnp.pad(x, ((0, Bp - B), (0, 0), (0, Lp - L)))

    # Biases as row vectors so they broadcast over the TB rows inside the kernel.
    b1r = b1.reshape(1, H)
    b2r = b2.reshape(1, C)

    bytes_x = Bp * C * Lp * itemsize
    param_bytes = (w1.size + w2.size + b1.size + b2.size) * 4
    cost = pl.CostEstimate(
        flops=4 * B * C * H + 2 * B * C * L,   # two tiny matmuls + pool + scale
        transcendentals=B * C,                  # sigmoid
        bytes_accessed=2 * bytes_x + param_bytes,
    )

    kernel = functools.partial(_se_block_kernel, inv_len=1.0 / L)

    out = pl.pallas_call(
        kernel,
        out_shape=jax.ShapeDtypeStruct((Bp, C, Lp), x.dtype),
        grid_spec=pltpu.PrefetchScalarGridSpec(
            num_scalar_prefetch=0,
            grid=(grid_b,),
            in_specs=[
                pl.BlockSpec((TB, C, Lp), lambda b: (b, 0, 0)),   # x batch tile
                pl.BlockSpec((H, C), lambda b: (0, 0)),           # W1 (resident)
                pl.BlockSpec((1, H), lambda b: (0, 0)),           # b1
                pl.BlockSpec((C, H), lambda b: (0, 0)),           # W2
                pl.BlockSpec((1, C), lambda b: (0, 0)),           # b2
            ],
            out_specs=pl.BlockSpec((TB, C, Lp), lambda b: (b, 0, 0)),
        ),
        compiler_params=pltpu.CompilerParams(
            dimension_semantics=("parallel",),
            vmem_limit_bytes=40 * 1024 * 1024,   # fits v7x's 64 MiB/TC with headroom
        ),
        cost_estimate=cost,
        input_output_aliases={0: 0} if donate_x else {},
    )(xp, w1, b1r, w2, b2r)

    if (Bp != B) or (Lp != L):
        out = out[:B, :, :L]
    return out


def se_block_ref(x, w1, b1, w2, b2):
    """Pure-JAX reference mirroring the PyTorch forward."""
    avg = jnp.mean(x, axis=-1)                      # (B, C)
    h = jax.nn.relu(avg @ w1.T + b1)                # (B, H)
    s = jax.nn.sigmoid(h @ w2.T + b2)[..., None]    # (B, C, 1)
    return x * s


if __name__ == "__main__":
    # Small shapes consistent with the module: in_channels=32, reduction=16.
    B, C, L = 4, 32, 128
    reduction = 16
    H = C // reduction

    key = jax.random.PRNGKey(0)
    kx, kw1, kb1, kw2, kb2 = jax.random.split(key, 5)

    x = jax.random.normal(kx, (B, C, L), dtype=jnp.float32)
    # Deterministic synthetic parameters (shapes match nn.Linear: weight (out, in)).
    w1 = jax.random.normal(kw1, (H, C), dtype=jnp.float32) * 0.1
    b1 = jax.random.normal(kb1, (H,), dtype=jnp.float32) * 0.1
    w2 = jax.random.normal(kw2, (C, H), dtype=jnp.float32) * 0.1
    b2 = jax.random.normal(kb2, (C,), dtype=jnp.float32) * 0.1

    out = jax.block_until_ready(se_block(x, w1, b1, w2, b2))

    # Sanity check against the pure-JAX reference.
    expected = se_block_ref(x, w1, b1, w2, b2)
    assert out.shape == (B, C, L)
    assert jnp.allclose(out, expected, atol=1e-5, rtol=1e-5)

    print("KERNEL_OK")
</pallas_src>

<mosaic_0001>
module attributes {stable_mosaic.version = 11 : i64} {
  func.func @_se_block_kernel(%arg0: i32, %arg1: memref<4x32x128xf32, #tpu.memory_space<vmem>>, %arg2: memref<2x32xf32, #tpu.memory_space<vmem>>, %arg3: memref<1x2xf32, #tpu.memory_space<vmem>>, %arg4: memref<32x2xf32, #tpu.memory_space<vmem>>, %arg5: memref<1x32xf32, #tpu.memory_space<vmem>>, %arg6: memref<4x32x128xf32, #tpu.memory_space<vmem>>) attributes {dimension_semantics = [#tpu.dimension_semantics<parallel>], iteration_bounds = array<i64: 1>, scalar_prefetch = 0 : i64, scratch_operands = 0 : i64, tpu.core_type = #tpu.core_type<tc>, window_params = [{transform_indices = @transform_0, window_bounds = array<i64: 4, 32, 128>}, {pipeline_mode = #tpu.pipeline_mode<synchronous>, transform_indices = @transform_1, window_bounds = array<i64: 2, 32>}, {pipeline_mode = #tpu.pipeline_mode<synchronous>, transform_indices = @transform_2, window_bounds = array<i64: 1, 2>}, {pipeline_mode = #tpu.pipeline_mode<synchronous>, transform_indices = @transform_3, window_bounds = array<i64: 32, 2>}, {pipeline_mode = #tpu.pipeline_mode<synchronous>, transform_indices = @transform_4, window_bounds = array<i64: 1, 32>}, {transform_indices = @transform_5, window_bounds = array<i64: 4, 32, 128>}]} {
    %c0 = arith.constant 0 : index
    %c0_0 = arith.constant 0 : index
    %c0_1 = arith.constant 0 : index
    %0 = vector.load %arg1[%c0, %c0_0, %c0_1] : memref<4x32x128xf32, #tpu.memory_space<vmem>>, vector<4x32x128xf32>
    %cst = arith.constant dense<0.000000e+00> : vector<4x32xf32>
    %1 = vector.multi_reduction <add>, %0, %cst [2] : vector<4x32x128xf32> to vector<4x32xf32>
    %cst_2 = arith.constant 7.812500e-03 : f32
    %2 = vector.broadcast %cst_2 : f32 to vector<4x32xf32>
    %3 = arith.mulf %1, %2 : vector<4x32xf32>
    %c0_3 = arith.constant 0 : index
    %c0_4 = arith.constant 0 : index
    %4 = vector.load %arg2[%c0_3, %c0_4] : memref<2x32xf32, #tpu.memory_space<vmem>>, vector<2x32xf32>
    "tpu.trace_start"() <{level = 10 : i32, message = "bc,hc->bh"}> : () -> ()
    %cst_5 = arith.constant dense<0.000000e+00> : vector<4x2xf32>
    %5 = tpu.matmul %3, %4, %cst_5 {dimension_numbers = #tpu.dot_dimension_numbers<[1], [1], [0], [0], [0, 0, 1, 0], [], []>} : vector<4x32xf32>, vector<2x32xf32>, vector<4x2xf32> -> vector<4x2xf32>
    "tpu.trace_stop"() : () -> ()
    %c0_6 = arith.constant 0 : index
    %c0_7 = arith.constant 0 : index
    %6 = vector.load %arg3[%c0_6, %c0_7] : memref<1x2xf32, #tpu.memory_space<vmem>>, vector<1x2xf32>
    %7 = vector.broadcast %6 : vector<1x2xf32> to vector<4x2xf32>
    %8 = arith.addf %5, %7 : vector<4x2xf32>
    %cst_8 = arith.constant 0.000000e+00 : f32
    %9 = vector.broadcast %cst_8 : f32 to vector<4x2xf32>
    %10 = arith.maximumf %8, %9 : vector<4x2xf32>
    %c0_9 = arith.constant 0 : index
    %c0_10 = arith.constant 0 : index
    %11 = vector.load %arg4[%c0_9, %c0_10] : memref<32x2xf32, #tpu.memory_space<vmem>>, vector<32x2xf32>
    "tpu.trace_start"() <{level = 10 : i32, message = "bh,ch->bc"}> : () -> ()
    %cst_11 = arith.constant dense<0.000000e+00> : vector<4x32xf32>
    %12 = tpu.matmul %10, %11, %cst_11 {dimension_numbers = #tpu.dot_dimension_numbers<[1], [1], [0], [0], [0, 0, 1, 0], [], []>} : vector<4x2xf32>, vector<32x2xf32>, vector<4x32xf32> -> vector<4x32xf32>
    "tpu.trace_stop"() : () -> ()
    %c0_12 = arith.constant 0 : index
    %c0_13 = arith.constant 0 : index
    %13 = vector.load %arg5[%c0_12, %c0_13] : memref<1x32xf32, #tpu.memory_space<vmem>>, vector<1x32xf32>
    %14 = vector.broadcast %13 : vector<1x32xf32> to vector<4x32xf32>
    %15 = arith.addf %12, %14 : vector<4x32xf32>
    %16 = arith.negf %15 : vector<4x32xf32>
    %17 = math.exp %16 : vector<4x32xf32>
    %cst_14 = arith.constant 1.000000e+00 : f32
    %18 = vector.broadcast %cst_14 : f32 to vector<4x32xf32>
    %19 = arith.addf %18, %17 : vector<4x32xf32>
    %20 = arith.divf %18, %19 : vector<4x32xf32>
    %c0_15 = arith.constant 0 : index
    %c0_16 = arith.constant 0 : index
    %c0_17 = arith.constant 0 : index
    %21 = vector.load %arg1[%c0_15, %c0_16, %c0_17] : memref<4x32x128xf32, #tpu.memory_space<vmem>>, vector<4x32x128xf32>
    %22 = vector.shape_cast %20 : vector<4x32xf32> to vector<4x32x1xf32>
    %23 = vector.broadcast %22 : vector<4x32x1xf32> to vector<4x32x128xf32>
    %24 = arith.mulf %21, %23 : vector<4x32x128xf32>
    %c0_18 = arith.constant 0 : index
    %c0_19 = arith.constant 0 : index
    %c0_20 = arith.constant 0 : index
    %25 = vector.load %arg6[%c0_18, %c0_19, %c0_20] : memref<4x32x128xf32, #tpu.memory_space<vmem>>, vector<4x32x128xf32>
    tpu.vector_store %arg6[%c0_18, %c0_19, %c0_20], %24 {strides = array<i32>} : memref<4x32x128xf32, #tpu.memory_space<vmem>>, vector<4x32x128xf32>,
    return
  }
  func.func @transform_0(%arg0: i32) -> (i32, i32, i32) {
    %c0_i32 = arith.constant 0 : i32
    %c0_i32_0 = arith.constant 0 : i32
    %c0_i32_1 = arith.constant 0 : i32
    return %arg0, %c0_i32, %c0_i32_0 : i32, i32, i32
  }
  func.func @transform_1(%arg0: i32) -> (i32, i32) {
    %c0_i32 = arith.constant 0 : i32
    %c0_i32_0 = arith.constant 0 : i32
    %c0_i32_1 = arith.constant 0 : i32
    return %c0_i32, %c0_i32_0 : i32, i32
  }
  func.func @transform_2(%arg0: i32) -> (i32, i32) {
    %c0_i32 = arith.constant 0 : i32
    %c0_i32_0 = arith.constant 0 : i32
    %c0_i32_1 = arith.constant 0 : i32
    return %c0_i32, %c0_i32_0 : i32, i32
  }
  func.func @transform_3(%arg0: i32) -> (i32, i32) {
    %c0_i32 = arith.constant 0 : i32
    %c0_i32_0 = arith.constant 0 : i32
    %c0_i32_1 = arith.constant 0 : i32
    return %c0_i32, %c0_i32_0 : i32, i32
  }
  func.func @transform_4(%arg0: i32) -> (i32, i32) {
    %c0_i32 = arith.constant 0 : i32
    %c0_i32_0 = arith.constant 0 : i32
    %c0_i32_1 = arith.constant 0 : i32
    return %c0_i32, %c0_i32_0 : i32, i32
  }
  func.func @transform_5(%arg0: i32) -> (i32, i32, i32) {
    %c0_i32 = arith.constant 0 : i32
    %c0_i32_0 = arith.constant 0 : i32
    %c0_i32_1 = arith.constant 0 : i32
    return %arg0, %c0_i32, %c0_i32_0 : i32, i32, i32
  }
}

</mosaic_0001>

<bundles_post_ra>
// kernel: tpu_custom_call.1
= control target key start
LH: loop header
LB: loop body
LE: loop exit
PB: predicated region body
PF: predicated region fallthrough
CT: control target
= control target key end

     0   :  { %10 = vsyncpa [#allocation3], 0  ;;  %s814_s0 = inlined_call_operand.hbm [shape: f32[4,32,128], index: 0, kind: input, shape index: {}]   ;;  %s815_s1 = inlined_call_operand.vmem [shape: f32[2,32], index: 1, kind: input, shape index: {}]   ;;  %s816_s2 = inlined_call_operand.vmem [shape: f32[1,2], index: 2, kind: input, shape index: {}]   ;;  %s817_s3 = inlined_call_operand.vmem [shape: f32[32,2], index: 3, kind: input, shape index: {}]   ;;  %s818_s4 = inlined_call_operand.vmem [shape: f32[1,32], index: 4, kind: input, shape index: {}]   ;;  %s819_s5 = inlined_call_operand.hbm [shape: f32[4,32,128], index: 5, kind: output, shape index: {}]  }
   0x1   :  { %11 = vsyncpa [#allocation4], 0  ;;  %s634_s18 = smov [#allocation2]   ;;  %s586_s22 = scalar_lea.hbm %s814_s0, 2048 }
   0x2   :  { %s17_s19 = sshll.u32 %s634_s18, 4  ;;  %p587_p0 = scmp.ne.s32.totalorder %s814_s0, %s586_s22  ;;  %s18_s19 = int_to_ptr.vmem [resolvable:$true] %s17_s19 }
   0x3   :  { %p590_p1 = scmp.lt.u32.totalorder %s586_s22, %s814_s0 }
   0x5   :  { %p592_p2 = pnand %p590_p1, %p587_p0 }
   0x7   :  { %595 = shalt.err (!%p592_p2)
}
   0x8   :  { %s596_s27 = scalar_lea.vmem %s18_s19, 2048  ;;  %p601_p4 = scmp.lt.s32.totalorder %s18_s19, %s18_s19 }
   0x9   :  { %p597_p3 = scmp.ne.s32.totalorder %s18_s19, %s596_s27  ;;  %p602_p5 = scmp.lt.s32.totalorder %s596_s27, %s596_s27 }
   0xb   :  { %p603_p6 = por %p602_p5, %p601_p4 }
   0xd   :  { %p604_p7 = pnand %p603_p6, %p597_p3 }
   0xf   :  { %607 = shalt.err (!%p604_p7)
}
  0x10   :  { %s635_s28 = smov 128   ;;  %s636_s29 = smov 8  }
  0x11   :  { %23 = dma.hbm_to_vmem [thread:$0]  %s814_s0, 2048, %s18_s19, [#allocation3], %s635_s28, %s635_s28, %s636_s29  }
  0x12   :  { %630 = dma.done.wait [#allocation3], 2048  }
  0x13   :  { %631 = vsyncadd [#allocation3], 4294965248  ;;  %v686_v0 = vld [vmem:[#allocation2 + $0x20] sm:$0xff]  ;;  %v692_v2 = vld [vmem:[#allocation2 + $0x28] sm:$0xff]  ;;  %v637_v16 = vmov 0.0   ;;  %vm213_vm0 = vcmask 261120   ;;  %v123_v31 = vlaneseq }
  0x14   :  { %v688_v1 = vld [vmem:[#allocation2] sm:$0xff]  ;;  %59 = vadd.xlane.f32.xlu1 %v686_v0  ;;  %v694_v3 = vld [vmem:[#allocation2 + $0x8] sm:$0xff]  ;;  %v698_v4 = vld [vmem:[#allocation2 + $0x30] sm:$0xff]  ;;  %551 = vmatprep.subr.mxu0 %v637_v16  ;;  %vm638_vm1 = vmmov 0   ;;  %vm301_vm2 = vcmask 15360   ;;  %v639_v20 = vmov 0.0|0.0  }
  0x15   :  { %51 = vadd.xlane.f32.xlu0 %v688_v1  ;;  %v700_v5 = vld [vmem:[#allocation2 + $0x10] sm:$0xff]  ;;  %v704_v6 = vld [vmem:[#allocation2 + $0x48] sm:$0xff]  ;;  %v706_v7 = vld [vmem:[#allocation2 + $0x40] sm:$0xff]  ;;  %553 = vmatprep.mubr.msk.f32.mxu0 %vm638_vm1, %v637_v16  ;;  %v124_v34 = vand.u32 127, %v123_v31  ;;  %v752_v35 = vshrl.u32 %v123_v31, 7  ;;  %vm134_vm4 = vcmask 130112  }
  0x16   :  { %v710_v8 = vld [vmem:[#allocation2 + $0x38] sm:$0xff]  ;;  %v716_v10 = vld [vmem:[#allocation2 + $0x60] sm:$0xff]  ;;  %v718_v11 = vld [vmem:[#allocation2 + $0x50] sm:$0xff]  ;;  %564 = vmatprep.mubr.msk.f32.mxu1 %vm638_vm1, %v637_v16  ;;  %567 = vmatprep.subr.bf16.mxu1 %v639_v20  ;;  %vm141_vm5 = vcmask 195712   ;;  %vm148_vm6 = vcmask 261312   ;;  %vm207_vm7 = vcmask 1041409  }
  0x17   :  { %v712_v9 = vld [vmem:[#allocation2 + $0x18] sm:$0xff]  ;;  %v724_v13 = vld [vmem:[#allocation2 + $0x68] sm:$0xff]  ;;  %v728_v14 = vld [vmem:[#allocation2 + $0x70] sm:$0xff]  ;;  %v129_v36 = vadd.s32 4294967288, %v124_v34  ;;  %v136_v37 = vadd.s32 4294967280, %v124_v34  ;;  %v127_v40 = vsub.s32 %v124_v34, %v752_v35  ;;  %v143_v41 = vadd.s32 4294967272, %v124_v34 }
  0x18   :  { %61 = vadd.xlane.f32.xlu1 %v692_v2  ;;  %v722_v12 = vld [vmem:[#allocation2 + $0x58] sm:$0xff]  ;;  %v99_v17 = vld [vmem:[%s815_s1] sm:$0x3]  ;;  %v291_v19 = vld [vmem:[%s817_s3 + $0x8] sm:$0xff]  ;;  %vm209_vm8 = vcmask 1042434   ;;  %vm211_vm9 = vcmask 1043459  }
  0x19   :  { %53 = vadd.xlane.f32.xlu0 %v694_v3  ;;  %v730_v15 = vld [vmem:[#allocation2 + $0x78] sm:$0xff]  ;;  %552 = vmatpush3.xpose.msk.msra.mxu0 %vm213_vm0, %v99_v17  ;;  %v290_v18 = vld [vmem:[%s817_s3] sm:$0xff]  ;;  %vm569_vm3 = vmpackc.low %vm301_vm2, %vm301_vm2  ;;  %v132_v43 = vsub.s32 %v129_v36, %v752_v35  ;;  %v139_v45 = vsub.s32 %v136_v37, %v752_v35  ;;  %v146_v54 = vsub.s32 %v143_v41, %v752_v35 }
  0x1a   :  { %v568_v21 = vpack.c.bf16 %v291_v19, %v290_v18  ;;  %v292_v22 = vld [vmem:[%s817_s3 + $0x10] sm:$0xff]  ;;  %v293_v23 = vld [vmem:[%s817_s3 + $0x18] sm:$0xff] }
  0x1b   :  { %v572_v24 = vpack.c.bf16 %v293_v23, %v292_v22 }
  0x1c   :  { %63 = vadd.xlane.f32.xlu1 %v698_v4  ;;  %570 = vmatpush3.bf16.xpose.msk.msra.mxu1 %vm569_vm3, %v568_v21 }
  0x1d   :  { %55 = vadd.xlane.f32.xlu0 %v700_v5  ;;  %571 = vmatprep.subr.bf16.mxu1 %v639_v20 }
  0x20   :  { %69 = vadd.xlane.f32.xlu1 %v704_v6 }
  0x21   :  { %67 = vadd.xlane.f32.xlu0 %v706_v7 }
  0x24   :  { %65 = vadd.xlane.f32.xlu1 %v710_v8  ;;  %574 = vmatpush3.bf16.xpose.msk.msra.mxu1 %vm569_vm3, %v572_v24 }
  0x25   :  { %57 = vadd.xlane.f32.xlu0 %v712_v9 }
  0x28   :  { %75 = vadd.xlane.f32.xlu1 %v716_v10 }
  0x29   :  { %71 = vadd.xlane.f32.xlu0 %v718_v11 }
  0x2c   :  { %73 = vadd.xlane.f32.xlu1 %v722_v12 }
  0x2d   :  { %77 = vadd.xlane.f32.xlu0 %v724_v13 }
  0x30   :  { %81 = vadd.xlane.f32.xlu1 %v730_v15 }
  0x31   :  { %79 = vadd.xlane.f32.xlu0 %v728_v14 }
  0xa1   :  { %v60_v25 = vpop.xlane.xlu1 %59 }
  0xa2   :  { %v52_v26 = vpop.xlane.xlu0 %51  ;;  %v87_v42 = vmul.f32 0.0078125, %v60_v25 }
  0xa3   :  { %v83_v46 = vmul.f32 0.0078125, %v52_v26 }
  0xa4   :  { %v153_v58 = vrot.slane %v87_v42, %v127_v40 }
  0xa5   :  { %v62_v27 = vpop.xlane.xlu1 %61  ;;  %v128_v60 = vrot.slane %v83_v46, %v127_v40 }
  0xa6   :  { %v54_v28 = vpop.xlane.xlu0 %53  ;;  %v88_v44 = vmul.f32 0.0078125, %v62_v27 }
  0xa7   :  { %v84_v47 = vmul.f32 0.0078125, %v54_v28 }
  0xa8   :  { %v157_v59 = vrot.slane %v88_v44, %v132_v43 }
  0xa9   :  { %v64_v29 = vpop.xlane.xlu1 %63  ;;  %v133_v61 = vrot.slane %v84_v47, %v132_v43 }
  0xaa   :  { %v56_v30 = vpop.xlane.xlu0 %55  ;;  %v89_v48 = vmul.f32 0.0078125, %v64_v29  ;;  %v158_v26 = vsel %vm134_vm4, %v157_v59, %v153_v58 }
  0xab   :  { %v85_v49 = vmul.f32 0.0078125, %v56_v30  ;;  %v135_v28 = vsel %vm134_vm4, %v133_v61, %v128_v60 }
  0xac   :  { %v162_v62 = vrot.slane %v89_v48, %v139_v45 }
  0xad   :  { %v70_v32 = vpop.xlane.xlu1 %69  ;;  %v140_v63 = vrot.slane %v85_v49, %v139_v45 }
  0xae   :  { %v68_v33 = vpop.xlane.xlu0 %67  ;;  %v92_v52 = vmul.f32 0.0078125, %v70_v32  ;;  %v163_v29 = vsel %vm141_vm5, %v162_v62, %v158_v26 }
  0xaf   :  { %v91_v53 = vmul.f32 0.0078125, %v68_v33  ;;  %v142_v33 = vsel %vm141_vm5, %v140_v63, %v135_v28  ;;  %v411_v63 = vsub.s32 0, %v752_v35 }
  0xb0   :  { %v176_v18 = vrot.slane %v92_v52, %v132_v43 }
  0xb1   :  { %v66_v38 = vpop.xlane.xlu1 %65  ;;  %v172_v19 = vrot.slane %v91_v53, %v127_v40 }
  0xb2   :  { %v58_v39 = vpop.xlane.xlu0 %57  ;;  %v90_v55 = vmul.f32 0.0078125, %v66_v38 }
  0xb3   :  { %v86_v56 = vmul.f32 0.0078125, %v58_v39  ;;  %v177_v34 = vsel %vm134_vm4, %v176_v18, %v172_v19  ;;  %v430_v18 = vsub.s32 1, %v752_v35 }
  0xb4   :  { %v167_v22 = vrot.slane %v90_v55, %v146_v54 }
  0xb5   :  { %v76_v50 = vpop.xlane.xlu1 %75  ;;  %v147_v23 = vrot.slane %v86_v56, %v146_v54  ;;  %v537_v56 = vld [vmem:[%s818_s4] ss:$0 sm:$0xff] }
  0xb6   :  { %v72_v51 = vpop.xlane.xlu0 %71  ;;  %v95_v24 = vmul.f32 0.0078125, %v76_v50  ;;  %v168_v38 = vsel %vm148_vm6, %v167_v22, %v163_v29  ;;  %v468_v22 = vsub.s32 3, %v752_v35 }
  0xb7   :  { %v93_v57 = vmul.f32 0.0078125, %v72_v51  ;;  %v149_v39 = vsel %vm148_vm6, %v147_v23, %v142_v33 }
  0xb8   :  { %v191_v41 = vrot.slane %v95_v24, %v127_v40  ;;  %v208_v49 = vsel %vm207_vm7, %v168_v38, %v149_v39  ;;  %v534_v40 = vld [vmem:[%s816_s2] ss:$0 sm:$0xff]  ;;  %s640_s2 = smov [#allocation5]  }
  0xb9   :  { %v74_v16 = vpop.xlane.xlu1 %73  ;;  %v181_v25 = vrot.slane %v93_v57, %v139_v45  ;;  %s522_s4 = sshll.u32 %s640_s2, 4  ;;  %s523_s4 = int_to_ptr.vmem [resolvable:$true] %s522_s4 }
  0xba   :  { %v78_v17 = vpop.xlane.xlu0 %77  ;;  %v94_v20 = vmul.f32 0.0078125, %v74_v16  ;;  %s608_s18 = scalar_lea.vmem %s523_s4, 2048  ;;  %p613_p9 = scmp.lt.s32.totalorder %s523_s4, %s523_s4 }
  0xbb   :  { %v96_v21 = vmul.f32 0.0078125, %v78_v17  ;;  %v182_v42 = vsel %vm141_vm5, %v181_v25, %v177_v34  ;;  %p609_p8 = scmp.ne.s32.totalorder %s523_s4, %s608_s18  ;;  %p614_p10 = scmp.lt.s32.totalorder %s608_s18, %s608_s18 }
  0xbc   :  { %v186_v27 = vrot.slane %v94_v20, %v146_v54  ;;  %v449_v20 = vsub.s32 2, %v752_v35 }
  0xbd   :  { %v195_v30 = vrot.slane %v96_v21, %v132_v43  ;;  %v82_v32 = vpop.xlane.xlu1 %81  ;;  %p615_p11 = por %p614_p10, %p613_p9 }
  0xbe   :  { %v80_v31 = vpop.xlane.xlu0 %79  ;;  %v98_v37 = vmul.f32 0.0078125, %v82_v32  ;;  %v187_v44 = vsel %vm148_vm6, %v186_v27, %v182_v42 }
  0xbf   :  { %v97_v36 = vmul.f32 0.0078125, %v80_v31  ;;  %v196_v47 = vsel %vm134_vm4, %v195_v30, %v191_v41  ;;  %v210_v51 = vsel %vm209_vm8, %v187_v44, %v208_v49  ;;  %p616_p12 = pnand %p615_p11, %p609_p8 }
  0xc0   :  { %v205_v43 = vrot.slane %v98_v37, %v146_v54 }
  0xc1   :  { %v200_v46 = vrot.slane %v97_v36, %v139_v45 }
  0xc3   :  { %v201_v48 = vsel %vm141_vm5, %v200_v46, %v196_v47 }
  0xc4   :  { %v206_v50 = vsel %vm148_vm6, %v205_v43, %v201_v48 }
  0xc5   :  { %v212_v52 = vsel %vm211_vm9, %v206_v50, %v210_v51 }
  0xc6   :  { %554 = vmatmul.mubr.msk.f32.vlgmr.msra.gmra.mrb[0].mxu0 %vm213_vm0, %v212_v52 }
 0x199   :  { %v285_v45 = vpop.f32.mrb[0].mxu0 }
 0x19a   :  { %v286_v53 = vadd.f32 %v534_v40, %v285_v45  ;;  %v555_v54 = vpop.f32.mrb[1].mxu0 }
 0x19c   :  { %v289_v55 = vmax.f32 %v286_v53, 0.0 }
 0x19e   :  { %565 = vmatmul.mubr.msk.f32.vlgmr.msra.gmra.mrb[0].mxu1 %vm301_vm2, %v289_v55 }
 0x271   :  { %v383_v57 = vpop.f32.mrb[0].mxu1 }
 0x272   :  { %v384_v58 = vadd.f32 %v537_v56, %v383_v57  ;;  %v566_v59 = vpop.f32.mrb[1].mxu1 }
 0x274   :  { %v543_v60 = vmul.f32 -1.442695, %v384_v58 }
 0x276   :  { %582 = vpow2.f32 %v543_v60 }
 0x280   :  { %v583_v61 = vpop.eup %582 }
 0x281   :  { %v390_v62 = vadd.f32 1.0, %v583_v61 }
 0x283   :  { %584 = vrcp.f32 %v390_v62 }
 0x28d   :  { %v585_v16 = vpop.eup %584 }
 0x28e   :  { %v412_v17 = vrot.slane %v585_v16, %v411_v63  ;;  %v431_v19 = vrot.slane %v585_v16, %v430_v18  ;;  %v450_v21 = vrot.slane %v585_v16, %v449_v20  ;;  %v469_v23 = vrot.slane %v585_v16, %v468_v22 }
 0x290   :  { %418 = vbcast.lane.b32.xlu1 %v412_v17, 264  ;;  %414 = vbcast.lane.b32.xlu0 %v412_v17, 256 }
 0x294   :  { %422 = vbcast.lane.b32.xlu1 %v412_v17, 272  ;;  %433 = vbcast.lane.b32.xlu0 %v431_v19, 256 }
 0x298   :  { %426 = vbcast.lane.b32.xlu1 %v412_v17, 280  ;;  %441 = vbcast.lane.b32.xlu0 %v431_v19, 272 }
 0x29c   :  { %437 = vbcast.lane.b32.xlu1 %v431_v19, 264  ;;  %452 = vbcast.lane.b32.xlu0 %v450_v21, 256 }
 0x2a0   :  { %445 = vbcast.lane.b32.xlu1 %v431_v19, 280  ;;  %460 = vbcast.lane.b32.xlu0 %v450_v21, 272 }
 0x2a4   :  { %456 = vbcast.lane.b32.xlu1 %v450_v21, 264  ;;  %471 = vbcast.lane.b32.xlu0 %v469_v23, 256 }
 0x2a8   :  { %464 = vbcast.lane.b32.xlu1 %v450_v21, 280  ;;  %479 = vbcast.lane.b32.xlu0 %v469_v23, 272 }
 0x2ac   :  { %475 = vbcast.lane.b32.xlu1 %v469_v23, 264 }
 0x2b0   :  { %483 = vbcast.lane.b32.xlu1 %v469_v23, 280 }
 0x302   :  { %v419_v24 = vpop.permute.xlu1 %418  ;;  %v415_v25 = vpop.permute.xlu0 %414 }
 0x303   :  { %v486_v26 = vmul.f32 %v419_v24, %v694_v3  ;;  %v485_v27 = vmul.f32 %v415_v25, %v688_v1 }
 0x305   :  { %502 = vst [vmem:[#allocation5 + $0x8] sm:$0xff] %v486_v26  ;;  %501 = vst [vmem:[#allocation5] sm:$0xff] %v485_v27 }
 0x306   :  { %v423_v28 = vpop.permute.xlu1 %422  ;;  %v434_v29 = vpop.permute.xlu0 %433 }
 0x307   :  { %v487_v35 = vmul.f32 %v423_v28, %v700_v5  ;;  %v489_v30 = vmul.f32 %v434_v29, %v686_v0 }
 0x309   :  { %503 = vst [vmem:[#allocation5 + $0x10] sm:$0xff] %v487_v35  ;;  %505 = vst [vmem:[#allocation5 + $0x20] sm:$0xff] %v489_v30 }
 0x30a   :  { %v427_v31 = vpop.permute.xlu1 %426  ;;  %v442_v32 = vpop.permute.xlu0 %441 }
 0x30b   :  { %v488_v33 = vmul.f32 %v427_v31, %v712_v9  ;;  %v491_v34 = vmul.f32 %v442_v32, %v698_v4 }
 0x30d   :  { %504 = vst [vmem:[#allocation5 + $0x18] sm:$0xff] %v488_v33  ;;  %507 = vst [vmem:[#allocation5 + $0x30] sm:$0xff] %v491_v34 }
 0x30e   :  { %v438_v3 = vpop.permute.xlu1 %437  ;;  %v453_v1 = vpop.permute.xlu0 %452 }
 0x30f   :  { %v490_v36 = vmul.f32 %v438_v3, %v692_v2  ;;  %v493_v37 = vmul.f32 %v453_v1, %v706_v7 }
 0x311   :  { %506 = vst [vmem:[#allocation5 + $0x28] sm:$0xff] %v490_v36  ;;  %509 = vst [vmem:[#allocation5 + $0x40] sm:$0xff] %v493_v37 }
 0x312   :  { %v446_v5 = vpop.permute.xlu1 %445  ;;  %v461_v0 = vpop.permute.xlu0 %460 }
 0x313   :  { %v492_v38 = vmul.f32 %v446_v5, %v710_v8  ;;  %v495_v39 = vmul.f32 %v461_v0, %v718_v11 }
 0x315   :  { %508 = vst [vmem:[#allocation5 + $0x38] sm:$0xff] %v492_v38  ;;  %511 = vst [vmem:[#allocation5 + $0x50] sm:$0xff] %v495_v39 }
 0x316   :  { %v457_v9 = vpop.permute.xlu1 %456  ;;  %v472_v4 = vpop.permute.xlu0 %471 }
 0x317   :  { %v494_v41 = vmul.f32 %v457_v9, %v704_v6  ;;  %v497_v42 = vmul.f32 %v472_v4, %v716_v10 }
 0x319   :  { %510 = vst [vmem:[#allocation5 + $0x48] sm:$0xff] %v494_v41  ;;  %513 = vst [vmem:[#allocation5 + $0x60] sm:$0xff] %v497_v42 }
 0x31a   :  { %v465_v2 = vpop.permute.xlu1 %464  ;;  %v480_v7 = vpop.permute.xlu0 %479 }
 0x31b   :  { %v496_v44 = vmul.f32 %v465_v2, %v722_v12  ;;  %v499_v46 = vmul.f32 %v480_v7, %v728_v14 }
 0x31d   :  { %512 = vst [vmem:[#allocation5 + $0x58] sm:$0xff] %v496_v44  ;;  %515 = vst [vmem:[#allocation5 + $0x70] sm:$0xff] %v499_v46 }
 0x31e   :  { %v476_v8 = vpop.permute.xlu1 %475 }
 0x31f   :  { %v498_v11 = vmul.f32 %v476_v8, %v724_v13 }
 0x321   :  { %514 = vst [vmem:[#allocation5 + $0x68] sm:$0xff] %v498_v11 }
 0x322   :  { %v484_v43 = vpop.permute.xlu1 %483 }
 0x323   :  { %v500_v6 = vmul.f32 %v484_v43, %v730_v15 }
 0x325   :  { %516 = vst [vmem:[#allocation5 + $0x78] sm:$0xff] %v500_v6 }
 0x326   :  { %619 = shalt.err (!%p616_p12)
}
 0x327   :  { %s620_s21 = scalar_lea.hbm %s819_s5, 2048 }
 0x328   :  { %p621_p13 = scmp.ne.s32.totalorder %s819_s5, %s620_s21  ;;  %p624_p0 = scmp.lt.u32.totalorder %s620_s21, %s819_s5 }
 0x32a   :  { %p626_p1 = pnand %p624_p0, %p621_p13 }
 0x32c   :  { %629 = shalt.err (!%p626_p1)
}
 0x32d   :  { %528 = dma.vmem_to_hbm [thread:$0]  %s523_s4, 2048, %s819_s5, [#allocation4], %s635_s28, %s635_s28, %s636_s29  }
 0x32e   :  { %632 = dma.done.wait [#allocation4], 2048  }
 0x32f   :  { %633 = vsyncadd [#allocation4], 4294965248 }
 0x330   :  { %532 = vsyncpa [#allocation3], 1 }
 0x331   :  { %533 = vsyncpa [#allocation4], 1 }

</bundles_post_ra>
